<compile_context>
chip_gen: v7x
topology: tpu7x:2x2x1
jax: 0.10.0
libtpu: 0.0.40
codegen_flags: <defaults>
</compile_context>

<pallas_src>
import jax
import jax.numpy as jnp
from jax.experimental import pallas as pl
from jax.experimental.pallas import tpu as pltpu
import numpy as np


def _features_linear_kernel(idx_ref, off_ref, emb_ref, bias_ref, out_ref):
    """One batch tile:  out[:, b] = bias + sum_f emb[:, idx[f, b] + off[f]].

    idx_ref : VMEM (F, TB) int32   -- batch on lanes
    off_ref : VMEM (F, 1) int32    -- constant block (fetched once)
    emb_ref : VMEM (D, V) float    -- transposed table, constant block (fetched once)
    bias_ref: VMEM (D, 1) float32
    out_ref : VMEM (D, TB) float32 -- lane-dense output tile
    """
    F, TB = idx_ref.shape
    D, V = emb_ref.shape

    # In-kernel "x + offsets" as a full-width vector add (lanes = batch).
    r = idx_ref[...] + off_ref[...]                              # (F, TB) int32

    # Multi-hot counts[v, b] = #{f : r[f, b] == v}; built with full-width compares.
    iota_v = jax.lax.broadcasted_iota(jnp.int32, (V, TB), 0)     # (V, TB)
    counts = jnp.zeros((V, TB), jnp.float32)
    for f in range(F):                                           # F is small & static;
        counts = counts + (iota_v == r[f : f + 1, :]).astype(jnp.float32)

    # Contract over the vocabulary on the MXU: (D, V) @ (V, TB) -> (D, TB).
    emb = emb_ref[...].astype(jnp.float32)
    out = jnp.dot(emb, counts, preferred_element_type=jnp.float32)

    # Single lane-dense store for the whole tile.
    out_ref[...] = out + bias_ref[...]


def _round_up(x, m):
    return (int(x) + m - 1) // m * m


def _vmem_budget(V, D, TB, emb_itemsize):
    """Generation-aware VMEM limit computed from *padded* resident footprints."""
    # (D, V) table tile: sublane pad to 8, lane pad to 128; Pallas allocates 2 buffers.
    tab = _round_up(max(D, 1), 8) * _round_up(V, 128) * int(emb_itemsize)
    # (V, TB) counts intermediate (f32), plus generous headroom for idx/out/bias tiles.
    cnt = _round_up(V, 8) * _round_up(TB, 128) * 4
    need = 2 * tab + 2 * cnt + (4 << 20)
    try:
        cap = int(pltpu.get_tpu_info().vmem_capacity_bytes)      # per-TensorCore
    except Exception:
        cap = 64 << 20                                           # conservative (v7x)
    return int(min(max(need, 16 << 20), cap - (8 << 20)))


def features_linear(x_idx, offsets, emb, bias, *, batch_tile=128):
    """x_idx: (B, F) int, offsets: (F,) int, emb: (V, D) float, bias: (D,) float -> (B, D)."""
    B, F = x_idx.shape
    V, D = emb.shape
    assert batch_tile % 128 == 0, "batch_tile must be a multiple of 128 (lane width)"
    TB = batch_tile
    B_pad = _round_up(B, TB)
    num_tiles = B_pad // TB

    # Layout plumbing (tiny int ops / table transpose; for D == 1 the transpose is a
    # free reshape).  Padded batch columns read index 0 and are sliced off below.
    idx_t = jnp.transpose(x_idx.astype(jnp.int32))               # (F, B)
    idx_t = jnp.pad(idx_t, ((0, 0), (0, B_pad - B)))             # (F, B_pad)
    off2 = offsets.astype(jnp.int32).reshape(F, 1)               # (F, 1)
    emb_t = jnp.transpose(emb)                                   # (D, V), V on lanes
    bias2 = bias.astype(jnp.float32).reshape(D, 1)               # (D, 1)

    vmem_limit = _vmem_budget(V, D, TB, emb.dtype.itemsize)

    out_t = pl.pallas_call(
        _features_linear_kernel,
        out_shape=jax.ShapeDtypeStruct((D, B_pad), jnp.float32),
        grid=(num_tiles,),
        in_specs=[
            # Per-tile indices: fields on sublanes, batch on lanes.
            pl.BlockSpec((F, TB), lambda i: (0, i)),
            # Field offsets: tiny constant block, fetched once.
            pl.BlockSpec((F, 1), lambda i: (0, 0)),
            # Embedding table (transposed): constant block index => DMA'd from HBM once.
            pl.BlockSpec((D, V), lambda i: (0, 0)),
            # Bias: tiny constant block.
            pl.BlockSpec((D, 1), lambda i: (0, 0)),
        ],
        # Lane-dense output: batch on lanes, one full-width store per grid step.
        out_specs=pl.BlockSpec((D, TB), lambda i: (0, i)),
        compiler_params=pltpu.CompilerParams(
            dimension_semantics=("parallel",),   # batch tiles shard across TCs (v7x)
            vmem_limit_bytes=vmem_limit,
        ),
    )(idx_t, off2, emb_t, bias2)

    return jnp.transpose(out_t)[:B]                              # (B, D)


if __name__ == "__main__":
    # Small, deterministic setup consistent with the module's __init__.
    field_dims = (10, 20, 30, 40)                    # vocab V = 100
    output_dim = 1
    batch = 16
    num_fields = len(field_dims)
    vocab = int(sum(field_dims))

    offsets_np = np.array((0, *np.cumsum(field_dims)[:-1]), dtype=np.int32)
    offsets = jnp.asarray(offsets_np)

    key = jax.random.PRNGKey(0)
    k_emb, k_x = jax.random.split(key)

    # Parameters: Embedding weight ~ N(0,1) (torch default-ish); bias zeros (as in module).
    emb = jax.random.normal(k_emb, (vocab, output_dim), dtype=jnp.float32)
    bias = jnp.zeros((output_dim,), dtype=jnp.float32)

    # Input indices: each column valid within its own field range.
    cols = []
    for fd in field_dims:
        k_x, sub = jax.random.split(k_x)
        cols.append(jax.random.randint(sub, (batch, 1), 0, fd, dtype=jnp.int32))
    x = jnp.concatenate(cols, axis=1)                # (batch, num_fields) int32

    out = features_linear(x, offsets, emb, bias, batch_tile=128)
    out = jax.block_until_ready(out)

    # Pure-JAX reference of the PyTorch forward.
    idx_full = x + offsets[None, :]
    ref = jnp.sum(emb[idx_full], axis=1) + bias[None, :]

    assert out.shape == (batch, output_dim), out.shape
    np.testing.assert_allclose(np.asarray(out), np.asarray(ref), rtol=1e-5, atol=1e-5)
    print("KERNEL_OK")
</pallas_src>

<mosaic_0001>
module attributes {stable_mosaic.version = 11 : i64} {
  func.func @_features_linear_kernel(%arg0: i32, %arg1: memref<4x128xi32, #tpu.memory_space<vmem>>, %arg2: memref<4x1xi32, #tpu.memory_space<vmem>>, %arg3: memref<1x100xf32, #tpu.memory_space<vmem>>, %arg4: memref<1x1xf32, #tpu.memory_space<vmem>>, %arg5: memref<1x128xf32, #tpu.memory_space<vmem>>) attributes {dimension_semantics = [#tpu.dimension_semantics<parallel>], iteration_bounds = array<i64: 1>, scalar_prefetch = 0 : i64, scratch_operands = 0 : i64, tpu.core_type = #tpu.core_type<tc>, window_params = [{transform_indices = @transform_0, window_bounds = array<i64: 4, 128>}, {pipeline_mode = #tpu.pipeline_mode<synchronous>, transform_indices = @transform_1, window_bounds = array<i64: 4, 1>}, {pipeline_mode = #tpu.pipeline_mode<synchronous>, transform_indices = @transform_2, window_bounds = array<i64: 1, 100>}, {pipeline_mode = #tpu.pipeline_mode<synchronous>, transform_indices = @transform_3, window_bounds = array<i64: 1, 1>}, {transform_indices = @transform_4, window_bounds = array<i64: 1, 128>}]} {
    %c0 = arith.constant 0 : index
    %c0_0 = arith.constant 0 : index
    %0 = vector.load %arg1[%c0, %c0_0] : memref<4x128xi32, #tpu.memory_space<vmem>>, vector<4x128xi32>
    %c0_1 = arith.constant 0 : index
    %c0_2 = arith.constant 0 : index
    %1 = vector.load %arg2[%c0_1, %c0_2] : memref<4x1xi32, #tpu.memory_space<vmem>>, vector<4x1xi32>
    %2 = vector.broadcast %1 : vector<4x1xi32> to vector<4x128xi32>
    %3 = arith.addi %0, %2 : vector<4x128xi32>
    %4 = tpu.iota {dimensions = array<i32: 0>} : vector<100x128xi32>
    %cst = arith.constant 0.000000e+00 : f32
    %5 = vector.broadcast %cst : f32 to vector<100x128xf32>
    %6 = vector.extract_strided_slice %3 {offsets = [0, 0], sizes = [1, 128], strides = [1, 1]} : vector<4x128xi32> to vector<1x128xi32>
    %7 = vector.broadcast %6 : vector<1x128xi32> to vector<100x128xi32>
    %8 = arith.cmpi eq, %4, %7 : vector<100x128xi32>
    %9 = arith.extui %8 : vector<100x128xi1> to vector<100x128xi32>
    %10 = arith.sitofp %9 : vector<100x128xi32> to vector<100x128xf32>
    %11 = arith.addf %5, %10 : vector<100x128xf32>
    %12 = vector.extract_strided_slice %3 {offsets = [1, 0], sizes = [1, 128], strides = [1, 1]} : vector<4x128xi32> to vector<1x128xi32>
    %13 = vector.broadcast %12 : vector<1x128xi32> to vector<100x128xi32>
    %14 = arith.cmpi eq, %4, %13 : vector<100x128xi32>
    %15 = arith.extui %14 : vector<100x128xi1> to vector<100x128xi32>
    %16 = arith.sitofp %15 : vector<100x128xi32> to vector<100x128xf32>
    %17 = arith.addf %11, %16 : vector<100x128xf32>
    %18 = vector.extract_strided_slice %3 {offsets = [2, 0], sizes = [1, 128], strides = [1, 1]} : vector<4x128xi32> to vector<1x128xi32>
    %19 = vector.broadcast %18 : vector<1x128xi32> to vector<100x128xi32>
    %20 = arith.cmpi eq, %4, %19 : vector<100x128xi32>
    %21 = arith.extui %20 : vector<100x128xi1> to vector<100x128xi32>
    %22 = arith.sitofp %21 : vector<100x128xi32> to vector<100x128xf32>
    %23 = arith.addf %17, %22 : vector<100x128xf32>
    %24 = vector.extract_strided_slice %3 {offsets = [3, 0], sizes = [1, 128], strides = [1, 1]} : vector<4x128xi32> to vector<1x128xi32>
    %25 = vector.broadcast %24 : vector<1x128xi32> to vector<100x128xi32>
    %26 = arith.cmpi eq, %4, %25 : vector<100x128xi32>
    %27 = arith.extui %26 : vector<100x128xi1> to vector<100x128xi32>
    %28 = arith.sitofp %27 : vector<100x128xi32> to vector<100x128xf32>
    %29 = arith.addf %23, %28 : vector<100x128xf32>
    %c0_3 = arith.constant 0 : index
    %c0_4 = arith.constant 0 : index
    %30 = vector.load %arg3[%c0_3, %c0_4] : memref<1x100xf32, #tpu.memory_space<vmem>>, vector<1x100xf32>
    %cst_5 = arith.constant dense<0.000000e+00> : vector<1x128xf32>
    %31 = tpu.matmul %30, %29, %cst_5 {dimension_numbers = #tpu.dot_dimension_numbers<[1], [0], [0], [1], [0, 0, 1, 1], [], []>} : vector<1x100xf32>, vector<100x128xf32>, vector<1x128xf32> -> vector<1x128xf32>
    %c0_6 = arith.constant 0 : index
    %c0_7 = arith.constant 0 : index
    %32 = vector.load %arg4[%c0_6, %c0_7] : memref<1x1xf32, #tpu.memory_space<vmem>>, vector<1x1xf32>
    %33 = vector.broadcast %32 : vector<1x1xf32> to vector<1x128xf32>
    %34 = arith.addf %31, %33 : vector<1x128xf32>
    %c0_8 = arith.constant 0 : index
    %c0_9 = arith.constant 0 : index
    %35 = vector.load %arg5[%c0_8, %c0_9] : memref<1x128xf32, #tpu.memory_space<vmem>>, vector<1x128xf32>
    tpu.vector_store %arg5[%c0_8, %c0_9], %34 {strides = array<i32>} : memref<1x128xf32, #tpu.memory_space<vmem>>, vector<1x128xf32>,
    return
  }
  func.func @transform_0(%arg0: i32) -> (i32, i32) {
    %c0_i32 = arith.constant 0 : i32
    %c0_i32_0 = arith.constant 0 : i32
    return %c0_i32, %arg0 : i32, i32
  }
  func.func @transform_1(%arg0: i32) -> (i32, i32) {
    %c0_i32 = arith.constant 0 : i32
    %c0_i32_0 = arith.constant 0 : i32
    %c0_i32_1 = arith.constant 0 : i32
    return %c0_i32, %c0_i32_0 : i32, i32
  }
  func.func @transform_2(%arg0: i32) -> (i32, i32) {
    %c0_i32 = arith.constant 0 : i32
    %c0_i32_0 = arith.constant 0 : i32
    %c0_i32_1 = arith.constant 0 : i32
    return %c0_i32, %c0_i32_0 : i32, i32
  }
  func.func @transform_3(%arg0: i32) -> (i32, i32) {
    %c0_i32 = arith.constant 0 : i32
    %c0_i32_0 = arith.constant 0 : i32
    %c0_i32_1 = arith.constant 0 : i32
    return %c0_i32, %c0_i32_0 : i32, i32
  }
  func.func @transform_4(%arg0: i32) -> (i32, i32) {
    %c0_i32 = arith.constant 0 : i32
    %c0_i32_0 = arith.constant 0 : i32
    return %c0_i32, %arg0 : i32, i32
  }
}

</mosaic_0001>

<bundles_post_ra>
// kernel: tpu_custom_call.1
= control target key start
LH: loop header
LB: loop body
LE: loop exit
PB: predicated region body
PF: predicated region fallthrough
CT: control target
= control target key end

     0   :  { %s767_s0 = inlined_call_operand.vmem [shape: s32[4,128], index: 0, kind: input, shape index: {}]   ;;  %s768_s1 = inlined_call_operand.vmem [shape: s32[4,1], index: 1, kind: input, shape index: {}]   ;;  %s769_s2 = inlined_call_operand.vmem [shape: f32[1,100], index: 2, kind: input, shape index: {}]   ;;  %s770_s3 = inlined_call_operand.<no memory space> [shape: f32[1,1], index: 3, kind: input, shape index: {}]   ;;  %s771_s4 = inlined_call_operand.hbm [shape: f32[1,128], index: 4, kind: output, shape index: {}]  }
   0x1   :  { %v9_v0 = vstv %s770_s3 }
   0x2   :  { %10 = vst [vmem:[#allocation2] sm:$0x1] %v9_v0 }
   0x3   :  { %v21_v1 = vld [vmem:[%s768_s1] sm:$0xf]  ;;  %v513_v2 = vmov 0  }
   0x4   :  { %488 = vset.pattern.permute.xlu0 %v513_v2 }
   0x5   :  { %11 = vsyncpa [#allocation4], 0  ;;  %23 = vperm.xlu0 %488, %v21_v1   ;;  %v514_v4 = vmov 0.0|0.0   ;;  %vm515_vm0 = vmmov 0   ;;  %v516_v5 = vmov 0.0   ;;  %v26_v6 = vlaneseq  ;;  %s517_s20 = smov [#allocation3]  }
   0x6   :  { %465 = vmatprep.subr.bf16.mxu0 %v514_v4  ;;  %462 = vmatprep.mubr.msk.f32.mxu0 %vm515_vm0, %v516_v5  ;;  %v20_v8 = vld [vmem:[%s767_s0] sm:$0xf]  ;;  %s360_s21 = sshll.u32 %s517_s20, 4  ;;  %s361_s21 = int_to_ptr.vmem [resolvable:$true] %s360_s21 }
   0x7   :  { %v551_v7 = vshrl.u32 %v26_v6, 7  ;;  %s489_s22 = scalar_lea.vmem %s361_s21, 16  ;;  %s493_s23 = scalar_lea.vmem %s361_s21, 32 }
   0x8   :  { %p490_p0 = scmp.ne.s32.totalorder %s361_s21, %s489_s22  ;;  %p494_p1 = scmp.lt.s32.totalorder %s361_s21, %s361_s21 }
   0x9   :  { %v265_v3 = vld [vmem:[#allocation2] sm:$0x1]  ;;  %v98_v9 = vsub.s32 1, %v551_v7  ;;  %v154_v10 = vsub.s32 2, %v551_v7  ;;  %v42_v11 = vsub.s32 0, %v551_v7  ;;  %v210_v12 = vsub.s32 3, %v551_v7  ;;  %p495_p2 = scmp.lt.s32.totalorder %s493_s23, %s489_s22 }
   0xa   :  { %268 = vperm.xlu0 %488, %v265_v3   ;;  %v28_v15 = vadd.s32 8, %v551_v7  ;;  %v29_v16 = vadd.s32 16, %v551_v7  ;;  %v30_v17 = vadd.s32 24, %v551_v7  ;;  %v564_v18 = vadd.s32 32, %v551_v7 }
   0xb   :  { %v567_v19 = vadd.s32 40, %v551_v7  ;;  %v570_v20 = vadd.s32 48, %v551_v7  ;;  %v573_v21 = vadd.s32 56, %v551_v7  ;;  %v584_v25 = vadd.s32 64, %v551_v7  ;;  %p496_p3 = por %p495_p2, %p494_p1 }
   0xc   :  { %v589_v27 = vadd.s32 72, %v551_v7  ;;  %v592_v28 = vadd.s32 80, %v551_v7  ;;  %v595_v29 = vadd.s32 88, %v551_v7  ;;  %v603_v30 = vadd.s32 96, %v551_v7 }
   0xd   :  { %p497_p4 = pnand %p496_p3, %p490_p0 }
  0x84   :  { %v24_v13 = vpop.permute.xlu0 %23 }
  0x85   :  { %v25_v14 = vadd.s32 %v24_v13, %v20_v8 }
  0x87   :  { %v575_v22 = vrot.slane %v25_v14, %v98_v9  ;;  %v577_v23 = vrot.slane %v25_v14, %v154_v10  ;;  %v581_v24 = vrot.slane %v25_v14, %v42_v11  ;;  %v586_v26 = vrot.slane %v25_v14, %v210_v12 }
  0x89   :  { %vm44_vm1 = vcmp.eq.s32.totalorder %v551_v7, %v581_v24  ;;  %vm45_vm2 = vcmp.eq.s32.totalorder %v28_v15, %v581_v24  ;;  %vm100_vm3 = vcmp.eq.s32.totalorder %v551_v7, %v575_v22  ;;  %vm101_vm4 = vcmp.eq.s32.totalorder %v28_v15, %v575_v22 }
  0x8a   :  { %v368_v31 = vsel %vm44_vm1, 1.0, %v516_v5  ;;  %v369_v32 = vsel %vm45_vm2, 1.0, %v516_v5  ;;  %v381_v33 = vsel %vm100_vm3, 1.0, %v516_v5  ;;  %v382_v34 = vsel %vm101_vm4, 1.0, %v516_v5 }
  0x8b   :  { %v139_v35 = vadd.f32 %v381_v33, %v368_v31  ;;  %vm156_vm5 = vcmp.eq.s32.totalorder %v551_v7, %v577_v23  ;;  %vm157_vm6 = vcmp.eq.s32.totalorder %v28_v15, %v577_v23  ;;  %v140_v36 = vadd.f32 %v382_v34, %v369_v32 }
  0x8c   :  { %v394_v37 = vsel %vm156_vm5, 1.0, %v516_v5  ;;  %v395_v38 = vsel %vm157_vm6, 1.0, %v516_v5  ;;  %vm212_vm7 = vcmp.eq.s32.totalorder %v551_v7, %v586_v26  ;;  %vm213_vm8 = vcmp.eq.s32.totalorder %v28_v15, %v586_v26 }
  0x8d   :  { %v195_v39 = vadd.f32 %v394_v37, %v139_v35  ;;  %v407_v40 = vsel %vm212_vm7, 1.0, %v516_v5  ;;  %vm46_vm9 = vcmp.eq.s32.totalorder %v29_v16, %v581_v24  ;;  %v196_v41 = vadd.f32 %v395_v38, %v140_v36 }
  0x8e   :  { %v408_v42 = vsel %vm213_vm8, 1.0, %v516_v5  ;;  %vm47_vm10 = vcmp.eq.s32.totalorder %v30_v17, %v581_v24  ;;  %v370_v43 = vsel %vm46_vm9, 1.0, %v516_v5  ;;  %vm102_vm11 = vcmp.eq.s32.totalorder %v29_v16, %v575_v22 }
  0x8f   :  { %v251_v44 = vadd.f32 %v407_v40, %v195_v39  ;;  %v371_v45 = vsel %vm47_vm10, 1.0, %v516_v5  ;;  %vm103_vm12 = vcmp.eq.s32.totalorder %v30_v17, %v575_v22  ;;  %v252_v46 = vadd.f32 %v408_v42, %v196_v41 }
  0x90   :  { %v383_v47 = vsel %vm102_vm11, 1.0, %v516_v5  ;;  %v384_v48 = vsel %vm103_vm12, 1.0, %v516_v5  ;;  %vm158_vm13 = vcmp.eq.s32.totalorder %v29_v16, %v577_v23  ;;  %vm159_vm14 = vcmp.eq.s32.totalorder %v30_v17, %v577_v23 }
  0x91   :  { %v141_v49 = vadd.f32 %v383_v47, %v370_v43  ;;  %v142_v50 = vadd.f32 %v384_v48, %v371_v45  ;;  %v396_v51 = vsel %vm158_vm13, 1.0, %v516_v5  ;;  %v466_v52 = vpack.c.bf16 %v252_v46, %v251_v44 }
  0x92   :  { %v397_v53 = vsel %vm159_vm14, 1.0, %v516_v5  ;;  %vm214_vm15 = vcmp.eq.s32.totalorder %v29_v16, %v586_v26  ;;  %vm215_vm0 = vcmp.eq.s32.totalorder %v30_v17, %v586_v26  ;;  %vm48_vm1 = vcmp.eq.s32.totalorder %v564_v18, %v581_v24 }
  0x93   :  { %v197_v54 = vadd.f32 %v396_v51, %v141_v49  ;;  %v198_v55 = vadd.f32 %v397_v53, %v142_v50  ;;  %v409_v56 = vsel %vm214_vm15, 1.0, %v516_v5  ;;  %v410_v57 = vsel %vm215_vm0, 1.0, %v516_v5  ;;  %467 = vmatpush3.bf16.msra.mxu0 %v466_v52 }
  0x94   :  { %vm49_vm2 = vcmp.eq.s32.totalorder %v567_v19, %v581_v24  ;;  %vm104_vm3 = vcmp.eq.s32.totalorder %v564_v18, %v575_v22  ;;  %vm105_vm4 = vcmp.eq.s32.totalorder %v567_v19, %v575_v22  ;;  %468 = vmatprep.subr.bf16.mxu0 %v514_v4  ;;  %v372_v60 = vsel %vm48_vm1, 1.0, %v516_v5 }
  0x95   :  { %v253_v58 = vadd.f32 %v409_v56, %v197_v54  ;;  %v254_v59 = vadd.f32 %v410_v57, %v198_v55  ;;  %v373_v61 = vsel %vm49_vm2, 1.0, %v516_v5  ;;  %v385_v62 = vsel %vm104_vm3, 1.0, %v516_v5 }
  0x96   :  { %v386_v63 = vsel %vm105_vm4, 1.0, %v516_v5  ;;  %vm160_vm5 = vcmp.eq.s32.totalorder %v564_v18, %v577_v23  ;;  %vm161_vm6 = vcmp.eq.s32.totalorder %v567_v19, %v577_v23  ;;  %v143_v1 = vadd.f32 %v385_v62, %v372_v60 }
  0x97   :  { %v469_v0 = vpack.c.bf16 %v254_v59, %v253_v58  ;;  %v144_v2 = vadd.f32 %v386_v63, %v373_v61  ;;  %v398_v3 = vsel %vm160_vm5, 1.0, %v516_v5  ;;  %v399_v6 = vsel %vm161_vm6, 1.0, %v516_v5 }
  0x98   :  { %vm216_vm7 = vcmp.eq.s32.totalorder %v564_v18, %v586_v26  ;;  %vm217_vm8 = vcmp.eq.s32.totalorder %v567_v19, %v586_v26  ;;  %vm50_vm9 = vcmp.eq.s32.totalorder %v570_v20, %v581_v24  ;;  %v199_v8 = vadd.f32 %v398_v3, %v143_v1 }
  0x99   :  { %470 = vmatpush3.bf16.msra.mxu0 %v469_v0  ;;  %v200_v9 = vadd.f32 %v399_v6, %v144_v2  ;;  %v411_v10 = vsel %vm216_vm7, 1.0, %v516_v5  ;;  %v412_v12 = vsel %vm217_vm8, 1.0, %v516_v5  ;;  %vm51_vm10 = vcmp.eq.s32.totalorder %v573_v21, %v581_v24 }
  0x9a   :  { %471 = vmatprep.subr.bf16.mxu0 %v514_v4  ;;  %v374_v13 = vsel %vm50_vm9, 1.0, %v516_v5  ;;  %vm106_vm11 = vcmp.eq.s32.totalorder %v570_v20, %v575_v22  ;;  %vm107_vm12 = vcmp.eq.s32.totalorder %v573_v21, %v575_v22  ;;  %v255_v14 = vadd.f32 %v411_v10, %v199_v8 }
  0x9b   :  { %v256_v15 = vadd.f32 %v412_v12, %v200_v9  ;;  %v375_v16 = vsel %vm51_vm10, 1.0, %v516_v5  ;;  %v387_v17 = vsel %vm106_vm11, 1.0, %v516_v5  ;;  %v388_v18 = vsel %vm107_vm12, 1.0, %v516_v5  ;;  %v269_v9 = vpop.permute.xlu0 %268 }
  0x9c   :  { %v145_v19 = vadd.f32 %v387_v17, %v374_v13  ;;  %vm162_vm13 = vcmp.eq.s32.totalorder %v570_v20, %v577_v23  ;;  %vm163_vm14 = vcmp.eq.s32.totalorder %v573_v21, %v577_v23  ;;  %v146_v32 = vadd.f32 %v388_v18, %v375_v16 }
  0x9d   :  { %v472_v31 = vpack.c.bf16 %v256_v15, %v255_v14  ;;  %v400_v33 = vsel %vm162_vm13, 1.0, %v516_v5  ;;  %v401_v34 = vsel %vm163_vm14, 1.0, %v516_v5  ;;  %vm218_vm15 = vcmp.eq.s32.totalorder %v570_v20, %v586_v26 }
  0x9e   :  { %v201_v35 = vadd.f32 %v400_v33, %v145_v19  ;;  %vm219_vm0 = vcmp.eq.s32.totalorder %v573_v21, %v586_v26  ;;  %vm52_vm1 = vcmp.eq.s32.totalorder %v584_v25, %v581_v24  ;;  %v202_v36 = vadd.f32 %v401_v34, %v146_v32 }
  0x9f   :  { %473 = vmatpush3.bf16.msra.mxu0 %v472_v31  ;;  %v413_v37 = vsel %vm218_vm15, 1.0, %v516_v5  ;;  %v414_v38 = vsel %vm219_vm0, 1.0, %v516_v5  ;;  %vm53_vm2 = vcmp.eq.s32.totalorder %v589_v27, %v581_v24  ;;  %v376_v20 = vsel %vm52_vm1, 1.0, %v516_v5 }
  0xa0   :  { %474 = vmatprep.subr.bf16.mxu0 %v514_v4  ;;  %v257_v39 = vadd.f32 %v413_v37, %v201_v35  ;;  %v377_v40 = vsel %vm53_vm2, 1.0, %v516_v5  ;;  %vm108_vm3 = vcmp.eq.s32.totalorder %v584_v25, %v575_v22  ;;  %v258_v21 = vadd.f32 %v414_v38, %v202_v36 }
  0xa1   :  { %vm109_vm4 = vcmp.eq.s32.totalorder %v589_v27, %v575_v22  ;;  %v389_v41 = vsel %vm108_vm3, 1.0, %v516_v5  ;;  %vm164_vm5 = vcmp.eq.s32.totalorder %v584_v25, %v577_v23  ;;  %vm165_vm6 = vcmp.eq.s32.totalorder %v589_v27, %v577_v23 }
  0xa2   :  { %v390_v42 = vsel %vm109_vm4, 1.0, %v516_v5  ;;  %v147_v43 = vadd.f32 %v389_v41, %v376_v20  ;;  %v402_v44 = vsel %vm164_vm5, 1.0, %v516_v5  ;;  %v475_v45 = vpack.c.bf16 %v258_v21, %v257_v39 }
  0xa3   :  { %v148_v46 = vadd.f32 %v390_v42, %v377_v40  ;;  %v403_v47 = vsel %vm165_vm6, 1.0, %v516_v5  ;;  %vm220_vm7 = vcmp.eq.s32.totalorder %v584_v25, %v586_v26  ;;  %vm221_vm8 = vcmp.eq.s32.totalorder %v589_v27, %v586_v26 }
  0xa4   :  { %v203_v48 = vadd.f32 %v402_v44, %v147_v43  ;;  %v415_v49 = vsel %vm220_vm7, 1.0, %v516_v5  ;;  %vm54_vm9 = vcmp.eq.s32.totalorder %v592_v28, %v581_v24  ;;  %476 = vmatpush3.bf16.msra.mxu0 %v475_v45  ;;  %v416_v51 = vsel %vm221_vm8, 1.0, %v516_v5 }
  0xa5   :  { %v204_v50 = vadd.f32 %v403_v47, %v148_v46  ;;  %vm55_vm10 = vcmp.eq.s32.totalorder %v595_v29, %v581_v24  ;;  %v378_v52 = vsel %vm54_vm9, 1.0, %v516_v5  ;;  %477 = vmatprep.subr.bf16.mxu0 %v514_v4  ;;  %vm110_vm11 = vcmp.eq.s32.totalorder %v592_v28, %v575_v22 }
  0xa6   :  { %v259_v25 = vadd.f32 %v415_v49, %v203_v48  ;;  %v379_v53 = vsel %vm55_vm10, 1.0, %v516_v5  ;;  %vm111_vm12 = vcmp.eq.s32.totalorder %v595_v29, %v575_v22  ;;  %v391_v54 = vsel %vm110_vm11, 1.0, %v516_v5 }
  0xa7   :  { %v260_v27 = vadd.f32 %v416_v51, %v204_v50  ;;  %v392_v55 = vsel %vm111_vm12, 1.0, %v516_v5  ;;  %vm166_vm13 = vcmp.eq.s32.totalorder %v592_v28, %v577_v23  ;;  %v149_v56 = vadd.f32 %v391_v54, %v378_v52 }
  0xa8   :  { %v150_v57 = vadd.f32 %v392_v55, %v379_v53  ;;  %vm167_vm14 = vcmp.eq.s32.totalorder %v595_v29, %v577_v23  ;;  %v404_v58 = vsel %vm166_vm13, 1.0, %v516_v5  ;;  %vm222_vm15 = vcmp.eq.s32.totalorder %v592_v28, %v586_v26 }
  0xa9   :  { %v478_v59 = vpack.c.bf16 %v260_v27, %v259_v25  ;;  %v405_v60 = vsel %vm167_vm14, 1.0, %v516_v5  ;;  %vm223_vm0 = vcmp.eq.s32.totalorder %v595_v29, %v586_v26  ;;  %v205_v61 = vadd.f32 %v404_v58, %v149_v56 }
  0xaa   :  { %v206_v62 = vadd.f32 %v405_v60, %v150_v57  ;;  %v417_v63 = vsel %vm222_vm15, 1.0, %v516_v5  ;;  %v418_v0 = vsel %vm223_vm0, 1.0, %v516_v5  ;;  %vm56_vm1 = vcmp.eq.s32.totalorder %v603_v30, %v581_v24 }
  0xab   :  { %479 = vmatpush3.bf16.msra.mxu0 %v478_v59  ;;  %vm112_vm2 = vcmp.eq.s32.totalorder %v603_v30, %v575_v22  ;;  %vm168_vm3 = vcmp.eq.s32.totalorder %v603_v30, %v577_v23  ;;  %v261_v28 = vadd.f32 %v417_v63, %v205_v61  ;;  %v380_v1 = vsel %vm56_vm1, 1.0, %v516_v5  ;;  %v264_v23 = vld [vmem:[%s769_s2] sm:$0x1] }
  0xac   :  { %480 = vmatprep.subr.bf16.mxu0 %v514_v4  ;;  %v262_v29 = vadd.f32 %v418_v0, %v206_v62  ;;  %v393_v2 = vsel %vm112_vm2, 1.0, %v516_v5  ;;  %v406_v8 = vsel %vm168_vm3, 1.0, %v516_v5  ;;  %vm224_vm4 = vcmp.eq.s32.totalorder %v603_v30, %v586_v26 }
  0xad   :  { %v151_v3 = vadd.f32 %v393_v2, %v380_v1  ;;  %v419_v22 = vsel %vm224_vm4, 1.0, %v516_v5  ;;  %vm279_vm5 = vcmask 1043456   ;;  %vm275_vm6 = vcmask 818176  }
  0xae   :  { %v481_v6 = vpack.c.bf16 %v262_v29, %v261_v28  ;;  %v274_v26 = vrot.slane %v269_v9, %v42_v11 }
  0xaf   :  { %v207_v24 = vadd.f32 %v406_v8, %v151_v3 }
  0xb0   :  { %482 = vmatpush3.bf16.msra.mxu0 %v481_v6 }
  0xb1   :  { %460 = vmatprep.subr.mxu0 %v516_v5  ;;  %v263_v4 = vadd.f32 %v419_v22, %v207_v24 }
  0xb4   :  { %461 = vmatpush3.msk.msra.mxu0 %vm279_vm5, %v263_v4 }
  0xb5   :  { %463 = vmatmul.mubr.msk.f32.vlgmr.msra.gmra.mrb[0].mxu0 %vm275_vm6, %v264_v23 }
 0x188   :  { %v349_v30 = vpop.f32.mrb[0].mxu0 }
 0x189   :  { %v350_v10 = vadd.f32 %v349_v30, %v274_v26  ;;  %v464_v12 = vpop.f32.mrb[1].mxu0 }
 0x18b   :  { %353 = vst [vmem:[#allocation3] sm:$0x1] %v350_v10 }
 0x18c   :  { %500 = shalt.err (!%p497_p4)
}
 0x18d   :  { %s501_s25 = scalar_lea.hbm %s771_s4, 16 }
 0x18e   :  { %p502_p5 = scmp.ne.s32.totalorder %s771_s4, %s501_s25  ;;  %p505_p6 = scmp.lt.u32.totalorder %s501_s25, %s771_s4 }
 0x190   :  { %p507_p7 = pnand %p505_p6, %p502_p5 }
 0x192   :  { %510 = shalt.err (!%p507_p7)
}
 0x193   :  { %363 = dma.vmem_to_hbm [thread:$0]  %s361_s21, 16, %s771_s4, [#allocation4]  }
 0x194   :  { %511 = dma.done.wait [#allocation4], 16  }
 0x195   :  { %512 = vsyncadd [#allocation4], 4294967280 }
 0x196   :  { %367 = vsyncpa [#allocation4], 1 }

</bundles_post_ra>
